<compile_context>
chip_gen: v7x
topology: tpu7x:2x2x1
jax: 0.10.0
libtpu: 0.0.40
codegen_flags: <defaults>
</compile_context>

<pallas_src>
import functools

import jax
import jax.numpy as jnp
from jax.experimental import pallas as pl
from jax.experimental.pallas import tpu as pltpu


def _round_up(x: int, m: int) -> int:
    return ((x + m - 1) // m) * m


def make_label_smoothing_ce_kernel(n_rows: int, classes: int, smoothing: float,
                                   block_rows: int):
    confidence = float(1.0 - smoothing)
    smooth_val = float(smoothing / (classes - 1))

    def kernel(pred_ref, tgt_ref, out_ref):
        step = pl.program_id(0)

        # HBM tile stays in its native dtype; convert in-register for compute.
        x = pred_ref[...].astype(jnp.float32)                 # (tN, C)
        tgt = tgt_ref[...]                                    # (tN, 1) int32

        # Row-wise log-sum-exp (per-row reductions only, no logp/true_dist
        # materialisation).
        m = jnp.max(x, axis=-1, keepdims=True)                # (tN, 1)
        lse = jnp.log(jnp.sum(jnp.exp(x - m), axis=-1, keepdims=True))
        mlse = m + lse                                        # (tN, 1)

        # Fused weighted reduction. sum_c(true_dist) == 1, so
        #   loss_row = -sum_c true_dist[c]*(x[c] - mlse) = mlse - sum_c w[c]*x[c]
        col = jax.lax.broadcasted_iota(jnp.int32, x.shape, 1)
        w = jnp.where(col == tgt, confidence, smooth_val)
        wsum = jnp.sum(w * x, axis=-1, keepdims=True)         # (tN, 1)
        per_row = mlse - wsum                                 # (tN, 1)

        # Mask ragged tail rows of the final block.  Applied AFTER per_row so
        # any garbage/NaN arising from out-of-range rows is dropped here.
        row_idx = (step * block_rows
                   + jax.lax.broadcasted_iota(jnp.int32, per_row.shape, 0))
        per_row = jnp.where(row_idx < n_rows, per_row, 0.0)

        # One partial sum per grid step, written as a lane-dense (8,128) block
        # (unmasked vst + tiny DMA); the wrapper reads element [:, 0, 0].
        partial = jnp.sum(per_row)
        out_ref[...] = jnp.full((1, 8, 128), partial, dtype=jnp.float32)

    return kernel


@functools.partial(jax.jit, static_argnames=("classes", "smoothing", "block_rows"))
def label_smoothing_cross_entropy(pred, target, classes, smoothing=0.0,
                                  block_rows=None):
    """pred: (N, C) float logits; target: (N,) int class indices -> scalar f32."""
    N, C = pred.shape
    assert classes == C, f"classes ({classes}) must equal pred.shape[1] ({C})"
    assert classes >= 2, "label smoothing needs at least 2 classes"

    if block_rows is None:
        # ~4 MiB of *input* bytes per logits tile.  With double-buffered inputs
        # plus the in-kernel f32 cast / exp / weight temporaries this stays
        # comfortably under a 32 MiB scoped-VMEM limit on every generation
        # (including v7x's 64 MiB physical VMEM).
        itemsize = jnp.dtype(pred.dtype).itemsize
        budget = 4 * 1024 * 1024
        rows = max(8, (budget // (C * itemsize)) // 8 * 8)
        block_rows = int(min(rows, _round_up(N, 8)))
    else:
        assert block_rows % 8 == 0, "block_rows must be a multiple of 8"

    num_blocks = pl.cdiv(N, block_rows)           # ragged final block allowed

    tgt = target.reshape(N, 1).astype(jnp.int32)

    kernel = make_label_smoothing_ce_kernel(N, classes, smoothing, block_rows)

    partials = pl.pallas_call(
        kernel,
        out_shape=jax.ShapeDtypeStruct((num_blocks, 8, 128), jnp.float32),
        grid=(num_blocks,),
        in_specs=[
            pl.BlockSpec((block_rows, C), lambda i: (i, 0)),
            pl.BlockSpec((block_rows, 1), lambda i: (i, 0)),
        ],
        out_specs=pl.BlockSpec((1, 8, 128), lambda i: (i, 0, 0)),
        compiler_params=pltpu.CompilerParams(
            dimension_semantics=("parallel",),
            vmem_limit_bytes=32 * 1024 * 1024,
        ),
    )(pred, tgt)

    return jnp.sum(partials[:, 0, 0]) * (1.0 / N)


def _reference(pred, target, classes, smoothing):
    # Pure-JAX reference mirroring the PyTorch module.
    logp = jax.nn.log_softmax(pred.astype(jnp.float32), axis=-1)
    confidence = 1.0 - smoothing
    smooth_val = smoothing / (classes - 1)
    true_dist = jnp.full_like(logp, smooth_val)
    true_dist = true_dist.at[jnp.arange(pred.shape[0]), target].set(confidence)
    return jnp.mean(jnp.sum(-true_dist * logp, axis=-1))


if __name__ == "__main__":
    smoothing = 0.1
    key = jax.random.PRNGKey(0)

    cases = [
        # (N, C, dtype, block_rows, atol)
        (8, 32, jnp.float32, None, 1e-5),    # single exact tile
        (13, 32, jnp.float32, None, 1e-5),   # ragged final (and only) block
        (20, 32, jnp.float32, 8, 1e-5),      # multi-block + ragged tail
        (16, 32, jnp.bfloat16, None, 1e-3),  # native-dtype HBM tile
        (100, 10, jnp.float32, None, 1e-5),  # CIFAR-10-like class count
    ]

    for N, C, dtype, br, atol in cases:
        key, k_pred, k_tgt = jax.random.split(key, 3)
        pred = jax.random.normal(k_pred, (N, C), dtype=jnp.float32).astype(dtype)
        target = jax.random.randint(k_tgt, (N,), 0, C, dtype=jnp.int32)

        loss = label_smoothing_cross_entropy(pred, target, classes=C,
                                             smoothing=smoothing,
                                             block_rows=br)
        loss = jax.block_until_ready(loss)

        ref = _reference(pred, target, C, smoothing)
        assert jnp.allclose(loss, ref, rtol=1e-4, atol=atol), (N, C, dtype, loss, ref)

    print("KERNEL_OK")
</pallas_src>

<mosaic_0001>
module attributes {stable_mosaic.version = 11 : i64} {
  func.func @kernel(%arg0: i32, %arg1: memref<8x32xf32, #tpu.memory_space<vmem>>, %arg2: memref<8x1xi32, #tpu.memory_space<vmem>>, %arg3: memref<1x8x128xf32, #tpu.memory_space<vmem>>) attributes {dimension_semantics = [#tpu.dimension_semantics<parallel>], iteration_bounds = array<i64: 1>, scalar_prefetch = 0 : i64, scratch_operands = 0 : i64, tpu.core_type = #tpu.core_type<tc>, window_params = [{transform_indices = @transform_0, window_bounds = array<i64: 8, 32>}, {transform_indices = @transform_1, window_bounds = array<i64: 8, 1>}, {transform_indices = @transform_2, window_bounds = array<i64: 1, 8, 128>}]} {
    %c0 = arith.constant 0 : index
    %c0_0 = arith.constant 0 : index
    %0 = vector.load %arg1[%c0, %c0_0] : memref<8x32xf32, #tpu.memory_space<vmem>>, vector<8x32xf32>
    %c0_1 = arith.constant 0 : index
    %c0_2 = arith.constant 0 : index
    %1 = vector.load %arg2[%c0_1, %c0_2] : memref<8x1xi32, #tpu.memory_space<vmem>>, vector<8x1xi32>
    %cst = arith.constant dense<0xFF800000> : vector<8xf32>
    %2 = vector.multi_reduction <maximumf>, %0, %cst [1] : vector<8x32xf32> to vector<8xf32>
    %3 = vector.shape_cast %2 : vector<8xf32> to vector<8x1xf32>
    %4 = vector.broadcast %3 : vector<8x1xf32> to vector<8x32xf32>
    %5 = arith.subf %0, %4 : vector<8x32xf32>
    %6 = math.exp %5 : vector<8x32xf32>
    %cst_3 = arith.constant dense<0.000000e+00> : vector<8xf32>
    %7 = vector.multi_reduction <add>, %6, %cst_3 [1] : vector<8x32xf32> to vector<8xf32>
    %8 = vector.shape_cast %7 : vector<8xf32> to vector<8x1xf32>
    %9 = math.log %8 : vector<8x1xf32>
    %10 = arith.addf %3, %9 : vector<8x1xf32>
    %11 = tpu.iota {dimensions = array<i32: 1>} : vector<8x32xi32>
    %12 = vector.broadcast %1 : vector<8x1xi32> to vector<8x32xi32>
    %13 = arith.cmpi eq, %11, %12 : vector<8x32xi32>
    %cst_4 = arith.constant 0.899999976 : f32
    %cst_5 = arith.constant 0.0032258064 : f32
    %14 = vector.broadcast %cst_4 : f32 to vector<8x32xf32>
    %15 = vector.broadcast %cst_5 : f32 to vector<8x32xf32>
    %16 = arith.select %13, %14, %15 : vector<8x32xi1>, vector<8x32xf32>
    %17 = arith.mulf %16, %0 : vector<8x32xf32>
    %cst_6 = arith.constant dense<0.000000e+00> : vector<8xf32>
    %18 = vector.multi_reduction <add>, %17, %cst_6 [1] : vector<8x32xf32> to vector<8xf32>
    %19 = vector.shape_cast %18 : vector<8xf32> to vector<8x1xf32>
    %20 = arith.subf %10, %19 : vector<8x1xf32>
    %c8_i32 = arith.constant 8 : i32
    %21 = arith.muli %arg0, %c8_i32 : i32
    %22 = tpu.iota {dimensions = array<i32: 0>} : vector<8x1xi32>
    %23 = vector.broadcast %21 : i32 to vector<8x1xi32>
    %24 = arith.addi %23, %22 : vector<8x1xi32>
    %c8_i32_7 = arith.constant 8 : i32
    %25 = vector.broadcast %c8_i32_7 : i32 to vector<8x1xi32>
    %26 = arith.cmpi slt, %24, %25 : vector<8x1xi32>
    %cst_8 = arith.constant 0.000000e+00 : f32
    %27 = vector.broadcast %cst_8 : f32 to vector<8x1xf32>
    %28 = arith.select %26, %20, %27 : vector<8x1xi1>, vector<8x1xf32>
    %29 = vector.shape_cast %28 : vector<8x1xf32> to vector<1x8x1xf32>
    %cst_9 = arith.constant dense<0.000000e+00> : vector<1xf32>
    %30 = vector.multi_reduction <add>, %29, %cst_9 [1, 2] : vector<1x8x1xf32> to vector<1xf32>
    %31 = vector.shape_cast %30 : vector<1xf32> to vector<1x1x1xf32>
    %32 = vector.extract %31[0, 0, 0] : f32 from vector<1x1x1xf32>
    %33 = vector.broadcast %32 : f32 to vector<1x8x128xf32>
    %c0_10 = arith.constant 0 : index
    %c0_11 = arith.constant 0 : index
    %c0_12 = arith.constant 0 : index
    %34 = vector.load %arg3[%c0_10, %c0_11, %c0_12] : memref<1x8x128xf32, #tpu.memory_space<vmem>>, vector<1x8x128xf32>
    tpu.vector_store %arg3[%c0_10, %c0_11, %c0_12], %33 {strides = array<i32>} : memref<1x8x128xf32, #tpu.memory_space<vmem>>, vector<1x8x128xf32>,
    return
  }
  func.func @transform_0(%arg0: i32) -> (i32, i32) {
    %c0_i32 = arith.constant 0 : i32
    %c0_i32_0 = arith.constant 0 : i32
    return %arg0, %c0_i32 : i32, i32
  }
  func.func @transform_1(%arg0: i32) -> (i32, i32) {
    %c0_i32 = arith.constant 0 : i32
    %c0_i32_0 = arith.constant 0 : i32
    return %arg0, %c0_i32 : i32, i32
  }
  func.func @transform_2(%arg0: i32) -> (i32, i32, i32) {
    %c0_i32 = arith.constant 0 : i32
    %c0_i32_0 = arith.constant 0 : i32
    %c0_i32_1 = arith.constant 0 : i32
    return %arg0, %c0_i32, %c0_i32_0 : i32, i32, i32
  }
}

</mosaic_0001>

<bundles_post_ra>
// kernel: label_smoothing_cross_entropy.1
= control target key start
LH: loop header
LB: loop body
LE: loop exit
PB: predicated region body
PF: predicated region fallthrough
CT: control target
= control target key end

     0   :  { %vm13_vm0 = vcmask 261120   ;;  %v71_v1 = vmov 0   ;;  %v26_v6 = vlaneseq  ;;  %v72_v10 = vmov 0.0032258064   ;;  %s100_s0 = inlined_call_operand.vmem [shape: f32[8,32], index: 0, kind: input, shape index: {}]   ;;  %s101_s1 = inlined_call_operand.vmem [shape: s32[8,1], index: 1, kind: input, shape index: {}]   ;;  %s102_s2 = inlined_call_operand.vmem [shape: f32[1,8,128], index: 2, kind: output, shape index: {}]  }
   0x1   :  { %v11_v0 = vld [vmem:[%s100_s0] sm:$0xff]  ;;  %66 = vset.pattern.permute.xlu0 %v71_v1  ;;  %vm45_vm2 = vcmask 7168  }
   0x2   :  { %v14_v2 = vsel %vm13_vm0, %v11_v0, -inf  ;;  %v12_v3 = vld [vmem:[%s101_s1] sm:$0xff]  ;;  %v27_v8 = vand.u32 127, %v26_v6 }
   0x3   :  { %15 = vmax.xlane.f32.xlu0 %v14_v2 }
  0x19   :  { %29 = vperm.xlu0 %66, %v12_v3  }
  0x90   :  { %v16_v4 = vpop.xlane.xlu0 %15 }
  0x91   :  { %v17_v5 = vsub.f32 %v11_v0, %v16_v4 }
  0x93   :  { %v18_v7 = vmul.f32 1.442695, %v17_v5 }
  0x95   :  { %67 = vpow2.f32 %v18_v7 }
  0x98   :  { %v30_v9 = vpop.permute.xlu0 %29 }
  0x99   :  { %vm31_vm1 = vcmp.eq.s32.totalorder %v27_v8, %v30_v9 }
  0x9a   :  { %v32_v11 = vsel %vm31_vm1, 0.9, %v72_v10 }
  0x9b   :  { %v33_v12 = vmul.f32 %v32_v11, %v11_v0 }
  0x9d   :  { %v34_v15 = vsel %vm13_vm0, %v33_v12, 0.0 }
  0x9f   :  { %v68_v13 = vpop.eup %67 }
  0xa0   :  { %v20_v14 = vsel %vm13_vm0, %v68_v13, 0.0 }
  0xa1   :  { %21 = vadd.xlane.f32.xlu1 %v20_v14 }
  0xa5   :  { %35 = vadd.xlane.f32.xlu1 %v34_v15 }
 0x12e   :  { %v22_v16 = vpop.xlane.xlu1 %21 }
 0x12f   :  { %69 = vlog2.f32 %v22_v16 }
 0x132   :  { %v36_v19 = vpop.xlane.xlu1 %35 }
 0x139   :  { %v70_v17 = vpop.eup %69 }
 0x13a   :  { %v24_v18 = vmul.f32 0.6931472, %v70_v17 }
 0x13c   :  { %v25_v20 = vadd.f32 %v24_v18, %v16_v4 }
 0x13e   :  { %v37_v21 = vsub.f32 %v25_v20, %v36_v19 }
 0x140   :  { %v46_v22 = vsel %vm45_vm2, %v37_v21, 0.0 }
 0x141   :  { %47 = vadd.xlane.f32.xlu1 %v46_v22 }
 0x1ce   :  { %v48_v23 = vpop.xlane.xlu1 %47 }
 0x1cf   :  { %v49_v24 = vrot.slane %v48_v23, 4 }
 0x1d1   :  { %v50_v25 = vadd.f32 %v49_v24, %v48_v23 }
 0x1d3   :  { %v51_v26 = vrot.slane %v50_v25, 2 }
 0x1d5   :  { %v52_v27 = vadd.f32 %v51_v26, %v50_v25 }
 0x1d7   :  { %v53_v28 = vrot.slane %v52_v27, 1 }
 0x1d9   :  { %v54_v29 = vadd.f32 %v53_v28, %v52_v27 }
 0x1db   :  { %62 = vpush %v54_v29 }
 0x20c   :  { %s63_s0 = spop %62 }
 0x20d   :  { %v56_v30 = vstv %s63_s0 }
 0x20e   :  { %57 = vst [vmem:[%s102_s2] sm:$0xff] %v56_v30 }

</bundles_post_ra>
